<compile_context>
chip_gen: v7x
topology: tpu7x:2x2x1
jax: 0.10.0
libtpu: 0.0.40
codegen_flags: <defaults>
</compile_context>

<pallas_src>
import jax
import jax.numpy as jnp
from jax.experimental import pallas as pl
from jax.experimental.pallas import tpu as pltpu


EMBED_DIM = 50                       # embedding_dim in the torch module
GENRE_DIM = EMBED_DIM // 2           # 25
IN_DIM = 2 * EMBED_DIM + GENRE_DIM   # 125
IN_PAD = 128                         # lane-aligned concat width
GENRE_PAD = IN_PAD - 2 * EMBED_DIM   # 28 (genre table column-padded with zeros)
H1 = 128
H2 = 64
H2_PAD = 128                         # lane-dense hidden width
OUT = 1
MAX_TB = 2048                        # batch tile (large tile -> near HBM roofline)


def _round_up(x, m):
    return (x + m - 1) // m * m


def _mlp_kernel(x_ref, w1_ref, b1_ref, w2_ref, b2_ref, w3_ref, b3_ref, o_ref):
    # x:(TB,128) bf16  w1:(128,128) bf16  b1:(1,128) f32
    # w2:(128,128) bf16 (cols 64: zero)   b2:(1,128) f32 (cols 64: zero)
    # w3:(1,128) f32 (cols 64: zero)      b3:(1,1) f32 in SMEM
    x = x_ref[...]
    h1 = jnp.dot(x, w1_ref[...], preferred_element_type=jnp.float32) + b1_ref[...]
    h1 = jnp.maximum(h1, 0.0)                       # ReLU (Dropout = id at eval)
    h2 = jnp.dot(h1.astype(jnp.bfloat16), w2_ref[...],
                 preferred_element_type=jnp.float32) + b2_ref[...]
    h2 = jnp.maximum(h2, 0.0)                       # ReLU (Dropout = id at eval)
    # Final (64 -> 1) layer off the MXU: VPU multiply + lane reduction.
    out = jnp.sum(h2 * w3_ref[...], axis=-1, keepdims=True) + b3_ref[0, 0]
    o_ref[...] = out.astype(o_ref.dtype)


def mlp_pallas(x, w1, b1, w2, b2, w3_row, b3):
    """x: (B, 128) bfloat16 -> (B, 1) float32."""
    B = x.shape[0]
    tb = min(MAX_TB, _round_up(B, 8))               # batch tile (multiple of 8)
    b_pad = _round_up(B, tb)
    if b_pad != B:
        x = jnp.pad(x, ((0, b_pad - B), (0, 0)))    # zero rows; sliced off below
    grid = (b_pad // tb,)

    out = pl.pallas_call(
        _mlp_kernel,
        out_shape=jax.ShapeDtypeStruct((b_pad, OUT), jnp.float32),
        grid=grid,
        in_specs=[
            pl.BlockSpec((tb, IN_PAD), lambda i: (i, 0)),        # x: tiled over batch
            pl.BlockSpec((IN_PAD, H1), lambda i: (0, 0)),        # w1: VMEM-resident
            pl.BlockSpec((1, H1), lambda i: (0, 0)),             # b1
            pl.BlockSpec((H1, H2_PAD), lambda i: (0, 0)),        # w2
            pl.BlockSpec((1, H2_PAD), lambda i: (0, 0)),         # b2
            pl.BlockSpec((1, H2_PAD), lambda i: (0, 0)),         # w3 row
            pl.BlockSpec(memory_space=pltpu.MemorySpace.SMEM),   # b3 scalar
        ],
        out_specs=pl.BlockSpec((tb, OUT), lambda i: (i, 0)),
        compiler_params=pltpu.CompilerParams(
            dimension_semantics=("parallel",),
            vmem_limit_bytes=32 * 1024 * 1024,
        ),
    )(x, w1, b1, w2, b2, w3_row, b3)
    return out[:B]


def init_params(key, num_users, num_books, num_genres, embedding_dim=EMBED_DIM):
    ks = jax.random.split(key, 9)
    genre_dim = embedding_dim // 2
    in_dim = embedding_dim * 2 + genre_dim

    def linear(kw, kb, fan_in, fan_out):
        # torch nn.Linear default init: U(-1/sqrt(fan_in), 1/sqrt(fan_in))
        bound = 1.0 / jnp.sqrt(jnp.float32(fan_in))
        w = jax.random.uniform(kw, (fan_in, fan_out), jnp.float32, -bound, bound)
        b = jax.random.uniform(kb, (1, fan_out), jnp.float32, -bound, bound)
        return w, b

    # nn.Embedding default init: N(0, 1)
    user_emb = jax.random.normal(ks[0], (num_users, embedding_dim), jnp.float32)
    book_emb = jax.random.normal(ks[1], (num_books, embedding_dim), jnp.float32)
    genre_emb = jax.random.normal(ks[2], (num_genres, genre_dim), jnp.float32)

    w1, b1 = linear(ks[3], ks[4], in_dim, H1)
    w2, b2 = linear(ks[5], ks[6], H1, H2)
    w3, b3 = linear(ks[7], ks[8], H2, OUT)

    # Zero-padding for lane alignment:
    #  genre table cols 25->28 (so gathered concat is exactly 128 wide),
    #  w1 rows 125->128, w2 cols / b2 / w3 64->128.
    genre_pad = jnp.zeros((num_genres, GENRE_PAD), jnp.float32).at[:, :genre_dim].set(genre_emb)
    w1_pad = jnp.zeros((IN_PAD, H1), jnp.float32).at[:in_dim, :].set(w1)
    w2_pad = jnp.zeros((H1, H2_PAD), jnp.float32).at[:, :H2].set(w2)
    b2_pad = jnp.zeros((1, H2_PAD), jnp.float32).at[:, :H2].set(b2)
    w3_row = jnp.zeros((1, H2_PAD), jnp.float32).at[:, :H2].set(w3[:, 0])

    return {
        "user_emb": user_emb.astype(jnp.bfloat16),    # (U, 50)
        "book_emb": book_emb.astype(jnp.bfloat16),    # (Bk, 50)
        "genre_emb": genre_pad.astype(jnp.bfloat16),  # (G, 28), cols 25:28 zero
        "w1": w1_pad.astype(jnp.bfloat16),            # (128, 128), rows 125:128 zero
        "b1": b1,                                     # (1, 128) f32
        "w2": w2_pad.astype(jnp.bfloat16),            # (128, 128), cols 64:128 zero
        "b2": b2_pad,                                 # (1, 128) f32
        "w3_row": w3_row,                             # (1, 128) f32, cols 64:128 zero
        "b3": b3,                                     # (1, 1) f32
    }


@jax.jit
def book_recommender_forward(params, user_idx, book_idx, genre_idx):
    # Embedding lookups + concat (XLA glue); output is already lane-aligned (B, 128) bf16.
    ue = jnp.take(params["user_emb"], user_idx, axis=0)    # (B, 50)
    be = jnp.take(params["book_emb"], book_idx, axis=0)    # (B, 50)
    ge = jnp.take(params["genre_emb"], genre_idx, axis=0)  # (B, 28), last 3 cols zero
    x = jnp.concatenate([ue, be, ge], axis=1)              # (B, 128) bf16
    out = mlp_pallas(x, params["w1"], params["b1"],
                     params["w2"], params["b2"],
                     params["w3_row"], params["b3"])       # (B, 1) f32
    return jnp.squeeze(out)                                # == rating.squeeze()


def reference_forward(params, user_idx, book_idx, genre_idx):
    # Pure-JAX reference mirroring the kernel's bf16 operand casts.
    ue = jnp.take(params["user_emb"], user_idx, axis=0).astype(jnp.float32)
    be = jnp.take(params["book_emb"], book_idx, axis=0).astype(jnp.float32)
    ge = jnp.take(params["genre_emb"], genre_idx, axis=0).astype(jnp.float32)
    x = jnp.concatenate([ue, be, ge], axis=1)
    h1 = jnp.maximum(x @ params["w1"].astype(jnp.float32) + params["b1"], 0.0)
    h1 = h1.astype(jnp.bfloat16).astype(jnp.float32)
    h2 = jnp.maximum(h1 @ params["w2"].astype(jnp.float32) + params["b2"], 0.0)
    out = jnp.sum(h2 * params["w3_row"], axis=-1) + params["b3"][0, 0]
    return out


if __name__ == "__main__":
    num_users, num_books, num_genres = 20, 30, 5
    batch = 8

    key = jax.random.PRNGKey(0)
    k_params, k_u, k_b, k_g = jax.random.split(key, 4)
    params = init_params(k_params, num_users, num_books, num_genres)

    user_idx = jax.random.randint(k_u, (batch,), 0, num_users, dtype=jnp.int32)
    book_idx = jax.random.randint(k_b, (batch,), 0, num_books, dtype=jnp.int32)
    genre_idx = jax.random.randint(k_g, (batch,), 0, num_genres, dtype=jnp.int32)

    rating = jax.block_until_ready(
        book_recommender_forward(params, user_idx, book_idx, genre_idx))
    ref = jax.block_until_ready(
        reference_forward(params, user_idx, book_idx, genre_idx))

    assert rating.shape == (batch,), rating.shape
    assert jnp.allclose(rating, ref, atol=1e-2, rtol=1e-2), (rating, ref)
    print("KERNEL_OK")
</pallas_src>

<mosaic_0001>
module attributes {stable_mosaic.version = 11 : i64} {
  func.func @_mlp_kernel(%arg0: i32, %arg1: memref<8x128xbf16, #tpu.memory_space<vmem>>, %arg2: memref<128x128xbf16, #tpu.memory_space<vmem>>, %arg3: memref<1x128xf32, #tpu.memory_space<vmem>>, %arg4: memref<128x128xbf16, #tpu.memory_space<vmem>>, %arg5: memref<1x128xf32, #tpu.memory_space<vmem>>, %arg6: memref<1x128xf32, #tpu.memory_space<vmem>>, %arg7: memref<1x1xf32, #tpu.memory_space<smem>>, %arg8: memref<8x1xf32, #tpu.memory_space<vmem>>) attributes {dimension_semantics = [#tpu.dimension_semantics<parallel>], iteration_bounds = array<i64: 1>, scalar_prefetch = 0 : i64, scratch_operands = 0 : i64, tpu.core_type = #tpu.core_type<tc>, window_params = [{transform_indices = @transform_0, window_bounds = array<i64: 8, 128>}, {pipeline_mode = #tpu.pipeline_mode<synchronous>, transform_indices = @transform_1, window_bounds = array<i64: 128, 128>}, {pipeline_mode = #tpu.pipeline_mode<synchronous>, transform_indices = @transform_2, window_bounds = array<i64: 1, 128>}, {pipeline_mode = #tpu.pipeline_mode<synchronous>, transform_indices = @transform_3, window_bounds = array<i64: 128, 128>}, {pipeline_mode = #tpu.pipeline_mode<synchronous>, transform_indices = @transform_4, window_bounds = array<i64: 1, 128>}, {pipeline_mode = #tpu.pipeline_mode<synchronous>, transform_indices = @transform_5, window_bounds = array<i64: 1, 128>}, {transform_indices = @transform_6, window_bounds = array<i64: 1, 1>}, {transform_indices = @transform_7, window_bounds = array<i64: 8, 1>}]} {
    %c0 = arith.constant 0 : index
    %c0_0 = arith.constant 0 : index
    %0 = vector.load %arg1[%c0, %c0_0] : memref<8x128xbf16, #tpu.memory_space<vmem>>, vector<8x128xbf16>
    %c0_1 = arith.constant 0 : index
    %c0_2 = arith.constant 0 : index
    %1 = vector.load %arg2[%c0_1, %c0_2] : memref<128x128xbf16, #tpu.memory_space<vmem>>, vector<128x128xbf16>
    %cst = arith.constant dense<0.000000e+00> : vector<8x128xf32>
    %2 = tpu.matmul %0, %1, %cst {dimension_numbers = #tpu.dot_dimension_numbers<[1], [0], [0], [1], [0, 0, 1, 1], [], []>} : vector<8x128xbf16>, vector<128x128xbf16>, vector<8x128xf32> -> vector<8x128xf32>
    %c0_3 = arith.constant 0 : index
    %c0_4 = arith.constant 0 : index
    %3 = vector.load %arg3[%c0_3, %c0_4] : memref<1x128xf32, #tpu.memory_space<vmem>>, vector<1x128xf32>
    %4 = vector.broadcast %3 : vector<1x128xf32> to vector<8x128xf32>
    %5 = arith.addf %2, %4 : vector<8x128xf32>
    %cst_5 = arith.constant 0.000000e+00 : f32
    %6 = vector.broadcast %cst_5 : f32 to vector<8x128xf32>
    %7 = arith.maximumf %5, %6 : vector<8x128xf32>
    %8 = arith.truncf %7 : vector<8x128xf32> to vector<8x128xbf16>
    %c0_6 = arith.constant 0 : index
    %c0_7 = arith.constant 0 : index
    %9 = vector.load %arg4[%c0_6, %c0_7] : memref<128x128xbf16, #tpu.memory_space<vmem>>, vector<128x128xbf16>
    %cst_8 = arith.constant dense<0.000000e+00> : vector<8x128xf32>
    %10 = tpu.matmul %8, %9, %cst_8 {dimension_numbers = #tpu.dot_dimension_numbers<[1], [0], [0], [1], [0, 0, 1, 1], [], []>} : vector<8x128xbf16>, vector<128x128xbf16>, vector<8x128xf32> -> vector<8x128xf32>
    %c0_9 = arith.constant 0 : index
    %c0_10 = arith.constant 0 : index
    %11 = vector.load %arg5[%c0_9, %c0_10] : memref<1x128xf32, #tpu.memory_space<vmem>>, vector<1x128xf32>
    %12 = vector.broadcast %11 : vector<1x128xf32> to vector<8x128xf32>
    %13 = arith.addf %10, %12 : vector<8x128xf32>
    %cst_11 = arith.constant 0.000000e+00 : f32
    %14 = vector.broadcast %cst_11 : f32 to vector<8x128xf32>
    %15 = arith.maximumf %13, %14 : vector<8x128xf32>
    %c0_12 = arith.constant 0 : index
    %c0_13 = arith.constant 0 : index
    %16 = vector.load %arg6[%c0_12, %c0_13] : memref<1x128xf32, #tpu.memory_space<vmem>>, vector<1x128xf32>
    %17 = vector.broadcast %16 : vector<1x128xf32> to vector<8x128xf32>
    %18 = arith.mulf %15, %17 : vector<8x128xf32>
    %cst_14 = arith.constant dense<0.000000e+00> : vector<8xf32>
    %19 = vector.multi_reduction <add>, %18, %cst_14 [1] : vector<8x128xf32> to vector<8xf32>
    %20 = vector.shape_cast %19 : vector<8xf32> to vector<8x1xf32>
    %c0_15 = arith.constant 0 : index
    %c0_16 = arith.constant 0 : index
    %21 = memref.load %arg7[%c0_15, %c0_16] : memref<1x1xf32, #tpu.memory_space<smem>>
    %22 = vector.broadcast %21 : f32 to vector<8x1xf32>
    %23 = arith.addf %20, %22 : vector<8x1xf32>
    %c0_17 = arith.constant 0 : index
    %c0_18 = arith.constant 0 : index
    %24 = vector.load %arg8[%c0_17, %c0_18] : memref<8x1xf32, #tpu.memory_space<vmem>>, vector<8x1xf32>
    tpu.vector_store %arg8[%c0_17, %c0_18], %23 {strides = array<i32>} : memref<8x1xf32, #tpu.memory_space<vmem>>, vector<8x1xf32>,
    return
  }
  func.func @transform_0(%arg0: i32) -> (i32, i32) {
    %c0_i32 = arith.constant 0 : i32
    %c0_i32_0 = arith.constant 0 : i32
    return %arg0, %c0_i32 : i32, i32
  }
  func.func @transform_1(%arg0: i32) -> (i32, i32) {
    %c0_i32 = arith.constant 0 : i32
    %c0_i32_0 = arith.constant 0 : i32
    %c0_i32_1 = arith.constant 0 : i32
    return %c0_i32, %c0_i32_0 : i32, i32
  }
  func.func @transform_2(%arg0: i32) -> (i32, i32) {
    %c0_i32 = arith.constant 0 : i32
    %c0_i32_0 = arith.constant 0 : i32
    %c0_i32_1 = arith.constant 0 : i32
    return %c0_i32, %c0_i32_0 : i32, i32
  }
  func.func @transform_3(%arg0: i32) -> (i32, i32) {
    %c0_i32 = arith.constant 0 : i32
    %c0_i32_0 = arith.constant 0 : i32
    %c0_i32_1 = arith.constant 0 : i32
    return %c0_i32, %c0_i32_0 : i32, i32
  }
  func.func @transform_4(%arg0: i32) -> (i32, i32) {
    %c0_i32 = arith.constant 0 : i32
    %c0_i32_0 = arith.constant 0 : i32
    %c0_i32_1 = arith.constant 0 : i32
    return %c0_i32, %c0_i32_0 : i32, i32
  }
  func.func @transform_5(%arg0: i32) -> (i32, i32) {
    %c0_i32 = arith.constant 0 : i32
    %c0_i32_0 = arith.constant 0 : i32
    %c0_i32_1 = arith.constant 0 : i32
    return %c0_i32, %c0_i32_0 : i32, i32
  }
  func.func @transform_6(%arg0: i32) -> (i32, i32) {
    %c0_i32 = arith.constant 0 : i32
    %c0_i32_0 = arith.constant 0 : i32
    %c0_i32_1 = arith.constant 0 : i32
    return %c0_i32, %c0_i32_0 : i32, i32
  }
  func.func @transform_7(%arg0: i32) -> (i32, i32) {
    %c0_i32 = arith.constant 0 : i32
    %c0_i32_0 = arith.constant 0 : i32
    return %arg0, %c0_i32 : i32, i32
  }
}

</mosaic_0001>

<bundles_post_ra>
// kernel: book_recommender_forward.1
= control target key start
LH: loop header
LB: loop body
LE: loop exit
PB: predicated region body
PF: predicated region fallthrough
CT: control target
= control target key end

     0   :  { %v368_v0 = vmov 0.0   ;;  %vm369_vm0 = vmmov 0   ;;  %vm267_vm1 = vcmask 7168   ;;  %s476_s1 = inlined_call_operand.vmem [shape: bf16[128,128], index: 1, kind: input, shape index: {}]   ;;  %s477_s3 = inlined_call_operand.vmem [shape: bf16[128,128], index: 3, kind: input, shape index: {}]   ;;  %s478_s0 = inlined_call_operand.vmem [shape: bf16[8,128], index: 0, kind: input, shape index: {}]   ;;  %s479_s2 = inlined_call_operand.vmem [shape: f32[1,128], index: 2, kind: input, shape index: {}]   ;;  %s480_s4 = inlined_call_operand.vmem [shape: f32[1,128], index: 4, kind: input, shape index: {}]   ;;  %s481_s5 = inlined_call_operand.vmem [shape: f32[1,128], index: 5, kind: input, shape index: {}]   ;;  %s482_s6 = inlined_call_operand.<no memory space> [shape: f32[1,1], index: 6, kind: input, shape index: {}]   ;;  %s483_s7 = inlined_call_operand.vmem [shape: f32[8,1], index: 7, kind: output, shape index: {}]  }
   0x1   :  { %310 = vmatprep.subr.bf16.mxu0 %v368_v0  ;;  %v352_v1 = vld [vmem:[%s476_s1] sm:$0xff]   ;;  %326 = vmatprep.mubr.msk.bf16.mxu0 %vm369_vm0, %v368_v0  ;;  %v353_v2 = vld [vmem:[%s476_s1 + $0x8] sm:$0xff]   ;;  %v354_v3 = vld [vmem:[%s476_s1 + $0x10] sm:$0xff]   ;;  %v265_v35 = vstv %s482_s6 }
   0x2   :  { %330 = vmatprep.subr.bf16.mxu1 %v368_v0  ;;  %346 = vmatprep.mubr.msk.bf16.mxu1 %vm369_vm0, %v368_v0  ;;  %v360_v4 = vld [vmem:[%s477_s3] sm:$0xff]   ;;  %v355_v5 = vld [vmem:[%s476_s1 + $0x18] sm:$0xff]   ;;  %v361_v6 = vld [vmem:[%s477_s3 + $0x8] sm:$0xff]  }
   0x3   :  { %311 = vmatpush3.bf16.msra.mxu0 %v352_v1  ;;  %331 = vmatpush3.bf16.msra.mxu1 %v360_v4  ;;  %v356_v7 = vld [vmem:[%s476_s1 + $0x20] sm:$0xff]   ;;  %v362_v8 = vld [vmem:[%s477_s3 + $0x10] sm:$0xff]   ;;  %v357_v9 = vld [vmem:[%s476_s1 + $0x28] sm:$0xff]  }
   0x4   :  { %312 = vmatprep.subr.bf16.mxu0 %v368_v0  ;;  %332 = vmatprep.subr.bf16.mxu1 %v368_v0  ;;  %v363_v10 = vld [vmem:[%s477_s3 + $0x18] sm:$0xff]   ;;  %v358_v11 = vld [vmem:[%s476_s1 + $0x30] sm:$0xff]   ;;  %v364_v12 = vld [vmem:[%s477_s3 + $0x20] sm:$0xff]  }
   0x5   :  { %v359_v13 = vld [vmem:[%s476_s1 + $0x38] sm:$0xff]   ;;  %v365_v14 = vld [vmem:[%s477_s3 + $0x28] sm:$0xff]   ;;  %v28_v15 = vld [vmem:[%s478_s0] sm:$0xf] }
   0x6   :  { %v366_v16 = vld [vmem:[%s477_s3 + $0x30] sm:$0xff]   ;;  %v367_v17 = vld [vmem:[%s477_s3 + $0x38] sm:$0xff]   ;;  %v273_v18 = vld [vmem:[%s479_s2] ss:$0 sm:$0xff] }
   0x7   :  { %313 = vmatpush3.bf16.msra.mxu0 %v353_v2  ;;  %333 = vmatpush3.bf16.msra.mxu1 %v361_v6  ;;  %v282_v26 = vld [vmem:[%s480_s4] ss:$0 sm:$0xff] }
   0x8   :  { %314 = vmatprep.subr.bf16.mxu0 %v368_v0  ;;  %334 = vmatprep.subr.bf16.mxu1 %v368_v0  ;;  %v291_v31 = vld [vmem:[%s481_s5] ss:$0 sm:$0xff] }
   0xb   :  { %315 = vmatpush3.bf16.msra.mxu0 %v354_v3  ;;  %335 = vmatpush3.bf16.msra.mxu1 %v362_v8 }
   0xc   :  { %316 = vmatprep.subr.bf16.mxu0 %v368_v0  ;;  %336 = vmatprep.subr.bf16.mxu1 %v368_v0 }
   0xf   :  { %317 = vmatpush3.bf16.msra.mxu0 %v355_v5  ;;  %337 = vmatpush3.bf16.msra.mxu1 %v363_v10 }
  0x10   :  { %318 = vmatprep.subr.bf16.mxu0 %v368_v0  ;;  %338 = vmatprep.subr.bf16.mxu1 %v368_v0 }
  0x13   :  { %319 = vmatpush3.bf16.msra.mxu0 %v356_v7  ;;  %339 = vmatpush3.bf16.msra.mxu1 %v364_v12 }
  0x14   :  { %320 = vmatprep.subr.bf16.mxu0 %v368_v0  ;;  %340 = vmatprep.subr.bf16.mxu1 %v368_v0 }
  0x17   :  { %321 = vmatpush3.bf16.msra.mxu0 %v357_v9  ;;  %341 = vmatpush3.bf16.msra.mxu1 %v365_v14 }
  0x18   :  { %322 = vmatprep.subr.bf16.mxu0 %v368_v0  ;;  %342 = vmatprep.subr.bf16.mxu1 %v368_v0 }
  0x1b   :  { %323 = vmatpush3.bf16.msra.mxu0 %v358_v11  ;;  %343 = vmatpush3.bf16.msra.mxu1 %v366_v16 }
  0x1c   :  { %324 = vmatprep.subr.bf16.mxu0 %v368_v0  ;;  %344 = vmatprep.subr.bf16.mxu1 %v368_v0 }
  0x1f   :  { %325 = vmatpush3.bf16.msra.mxu0 %v359_v13  ;;  %345 = vmatpush3.bf16.msra.mxu1 %v367_v17 }
  0x22   :  { %327 = vmatmul.mubr.bf16.vlgmr.msra.gmra.mrb[0].mxu0 %v28_v15 }
  0xf5   :  { %v134_v19 = vpop.f32.mrb[0].mxu0 }
  0xf6   :  { %v135_v20 = vadd.f32 %v273_v18, %v134_v19  ;;  %v328_v21 = vpop.f32.mrb[1].mxu0 }
  0xf7   :  { %v137_v22 = vpop.f32.mrb[2].mxu0 }
  0xf8   :  { %v140_v23 = vmax.f32 %v135_v20, 0.0  ;;  %v329_v24 = vpop.f32.mrb[3].mxu0 }
  0xfa   :  { %v141_v25 = vpack.c.bf16 %v140_v23, %v140_v23 }
  0xfc   :  { %347 = vmatmul.mubr.bf16.vlgmr.msra.gmra.mrb[0].mxu1 %v141_v25 }
 0x1cf   :  { %v247_v27 = vpop.f32.mrb[0].mxu1 }
 0x1d0   :  { %v248_v28 = vadd.f32 %v282_v26, %v247_v27  ;;  %v348_v29 = vpop.f32.mrb[1].mxu1 }
 0x1d1   :  { %v250_v30 = vpop.f32.mrb[2].mxu1 }
 0x1d2   :  { %v253_v32 = vmax.f32 %v248_v28, 0.0  ;;  %v349_v33 = vpop.f32.mrb[3].mxu1 }
 0x1d4   :  { %v261_v34 = vmul.f32 %v291_v31, %v253_v32 }
 0x1d6   :  { %262 = vadd.xlane.f32.xlu0 %v261_v34 }
 0x263   :  { %v263_v36 = vpop.xlane.xlu0 %262 }
 0x264   :  { %v266_v37 = vadd.f32 %v265_v35, %v263_v36 }
 0x266   :  { %268 = vst.msk [vmem:[%s483_s7] sm:$0xff] %vm267_vm1, %v266_v37 }

</bundles_post_ra>
